<compile_context>
chip_gen: v7x
topology: tpu7x:2x2x1
jax: 0.10.0
libtpu: 0.0.40
codegen_flags: <defaults>
</compile_context>

<pallas_src>
import functools

import jax
import jax.numpy as jnp
from jax.experimental import pallas as pl
from jax.experimental.pallas import tpu as pltpu


def _sobel_kernel(x_ref, o_ref, *, H: int, W: int, eps: float):
    """x_ref/o_ref: (Bp, H*W) blocks, each plane flattened along the lane dim."""
    HW = H * W
    x = x_ref[...].astype(jnp.float32)                  # (Bp, HW)

    # Flattened index i = h*W + w. (1, HW) masks broadcast across planes and
    # exactly reproduce the zero-padding (padding=1) boundary semantics.
    idx = jax.lax.broadcasted_iota(jnp.int32, (1, HW), 1)
    col = idx % W
    up_ok    = idx >= W                  # row h-1 exists
    down_ok  = idx < (H - 1) * W         # row h+1 exists
    left_ok  = col > 0                   # col w-1 exists
    right_ok = col < (W - 1)             # col w+1 exists

    # Vertical neighbours: lane rolls by +/-W (positive equivalents). Rolls act
    # along the per-plane flattened axis only, so planes never mix; wrapped
    # elements are exactly the ones masked to zero.
    up   = jnp.where(up_ok,   pltpu.roll(x, W, axis=1), 0.0)        # x[h-1, w]
    down = jnp.where(down_ok, pltpu.roll(x, HW - W, axis=1), 0.0)   # x[h+1, w]

    # Separable Sobel: kernel_x = [1,2,1]^T (x) [1,0,-1]
    #                  kernel_y = [1,0,-1]^T (x) [1,2,1]
    sv = up + 2.0 * x + down             # vertical [1,2,1] smooth (for Gx)
    dv = up - down                       # vertical [1,0,-1] diff  (for Gy)

    sv_l = jnp.where(left_ok,  pltpu.roll(sv, 1, axis=1), 0.0)      # sv[h, w-1]
    sv_r = jnp.where(right_ok, pltpu.roll(sv, HW - 1, axis=1), 0.0) # sv[h, w+1]
    dv_l = jnp.where(left_ok,  pltpu.roll(dv, 1, axis=1), 0.0)
    dv_r = jnp.where(right_ok, pltpu.roll(dv, HW - 1, axis=1), 0.0)

    gx = sv_l - sv_r                     # horizontal [1,0,-1] on sv
    gy = dv_l + 2.0 * dv + dv_r          # horizontal [1,2,1] on dv

    o_ref[...] = jnp.sqrt(gx * gx + gy * gy + eps).astype(o_ref.dtype)


@functools.partial(jax.jit, static_argnames=("eps",))
def sobel_magnitude(x, eps: float = 1e-5):
    """x: (N, C, H, W) -> (N, C, H, W) depthwise Sobel gradient magnitude."""
    N, C, H, W = x.shape
    P, HW = N * C, H * W
    x2 = x.reshape(P, HW)                # free reshape (contiguous), no HBM pass

    plane_bytes = HW * x2.dtype.itemsize
    TARGET_BLOCK_BYTES = 1 << 20         # ~1 MiB input per grid step
    if P <= 8:
        bp = P                           # full extent along planes (always legal)
    else:
        # (8,128) rule: a non-full second-to-last block dim must be a multiple
        # of 8; the last dim is always full-extent (HW) here.
        bp = max(8, min(P, (TARGET_BLOCK_BYTES // max(plane_bytes, 1)) // 8 * 8))

    block_bytes = bp * plane_bytes
    # in + out, double-buffered, plus slack for in-kernel temporaries.
    vmem_limit = int(max(32 << 20, min(10 * block_bytes, 100 << 20)))

    kernel = functools.partial(_sobel_kernel, H=H, W=W, eps=eps)
    out2 = pl.pallas_call(
        kernel,
        out_shape=jax.ShapeDtypeStruct((P, HW), x.dtype),
        grid_spec=pltpu.PrefetchScalarGridSpec(
            num_scalar_prefetch=0,
            grid=(pl.cdiv(P, bp),),
            in_specs=[pl.BlockSpec((bp, HW), lambda i: (i, 0))],
            out_specs=pl.BlockSpec((bp, HW), lambda i: (i, 0)),
        ),
        compiler_params=pltpu.CompilerParams(
            dimension_semantics=("parallel",),
            vmem_limit_bytes=vmem_limit,
        ),
    )(x2)
    return out2.reshape(N, C, H, W)


def _reference(x, eps: float = 1e-5):
    # Pure-JAX reference: depthwise conv2d, padding=1, groups=C.
    N, C, H, W = x.shape
    kx = jnp.array([[1., 0., -1.], [2., 0., -2.], [1., 0., -1.]], jnp.float32)
    ky = jnp.array([[1., 2., 1.], [0., 0., 0.], [-1., -2., -1.]], jnp.float32)
    wx = jnp.broadcast_to(kx[None, None], (C, 1, 3, 3))
    wy = jnp.broadcast_to(ky[None, None], (C, 1, 3, 3))
    dn = ('NCHW', 'OIHW', 'NCHW')
    gx = jax.lax.conv_general_dilated(x, wx, (1, 1), ((1, 1), (1, 1)),
                                      dimension_numbers=dn,
                                      feature_group_count=C)
    gy = jax.lax.conv_general_dilated(x, wy, (1, 1), ((1, 1), (1, 1)),
                                      dimension_numbers=dn,
                                      feature_group_count=C)
    return jnp.sqrt(gx ** 2 + gy ** 2 + eps)


if __name__ == "__main__":
    key = jax.random.PRNGKey(0)
    N, C, H, W = 2, 4, 16, 16
    x = jax.random.normal(key, (N, C, H, W), dtype=jnp.float32)

    out = jax.block_until_ready(sobel_magnitude(x))
    ref = jax.block_until_ready(_reference(x))

    assert out.shape == (N, C, H, W)
    assert jnp.allclose(out, ref, atol=1e-4, rtol=1e-4)

    print("KERNEL_OK")
</pallas_src>

<mosaic_0001>
module attributes {stable_mosaic.version = 11 : i64} {
  func.func @_sobel_kernel(%arg0: i32, %arg1: memref<8x256xf32, #tpu.memory_space<vmem>>, %arg2: memref<8x256xf32, #tpu.memory_space<vmem>>) attributes {dimension_semantics = [#tpu.dimension_semantics<parallel>], iteration_bounds = array<i64: 1>, scalar_prefetch = 0 : i64, scratch_operands = 0 : i64, tpu.core_type = #tpu.core_type<tc>, window_params = [{transform_indices = @transform_0, window_bounds = array<i64: 8, 256>}, {transform_indices = @transform_1, window_bounds = array<i64: 8, 256>}]} {
    %c0 = arith.constant 0 : index
    %c0_0 = arith.constant 0 : index
    %0 = vector.load %arg1[%c0, %c0_0] : memref<8x256xf32, #tpu.memory_space<vmem>>, vector<8x256xf32>
    %1 = tpu.iota {dimensions = array<i32: 1>} : vector<1x256xi32>
    %c16_i32 = arith.constant 16 : i32
    %c0_i32 = arith.constant 0 : i32
    %2 = arith.cmpi eq, %c16_i32, %c0_i32 : i32
    %c1_i32 = arith.constant 1 : i32
    %3 = arith.select %2, %c1_i32, %c16_i32 : i32
    %4 = vector.broadcast %3 : i32 to vector<1x256xi32>
    %5 = arith.remsi %1, %4 : vector<1x256xi32>
    %c0_i32_1 = arith.constant 0 : i32
    %6 = vector.broadcast %c0_i32_1 : i32 to vector<1x256xi32>
    %7 = arith.cmpi ne, %5, %6 : vector<1x256xi32>
    %c0_i32_2 = arith.constant 0 : i32
    %8 = vector.broadcast %c0_i32_2 : i32 to vector<1x256xi32>
    %9 = arith.cmpi slt, %5, %8 : vector<1x256xi32>
    %c0_i32_3 = arith.constant 0 : i32
    %10 = arith.cmpi slt, %3, %c0_i32_3 : i32
    %11 = vector.broadcast %10 : i1 to vector<1x256xi1>
    %12 = vector.broadcast %11 : vector<1x256xi1> to vector<1x256xi1>
    %13 = arith.xori %9, %12 : vector<1x256xi1>
    %14 = arith.andi %13, %7 : vector<1x256xi1>
    %15 = vector.broadcast %3 : i32 to vector<1x256xi32>
    %16 = arith.addi %5, %15 : vector<1x256xi32>
    %17 = arith.select %14, %16, %5 : vector<1x256xi1>, vector<1x256xi32>
    %c16_i32_4 = arith.constant 16 : i32
    %18 = vector.broadcast %c16_i32_4 : i32 to vector<1x256xi32>
    %19 = arith.cmpi sge, %1, %18 : vector<1x256xi32>
    %c240_i32 = arith.constant 240 : i32
    %20 = vector.broadcast %c240_i32 : i32 to vector<1x256xi32>
    %21 = arith.cmpi slt, %1, %20 : vector<1x256xi32>
    %c0_i32_5 = arith.constant 0 : i32
    %22 = vector.broadcast %c0_i32_5 : i32 to vector<1x256xi32>
    %23 = arith.cmpi sgt, %17, %22 : vector<1x256xi32>
    %c15_i32 = arith.constant 15 : i32
    %24 = vector.broadcast %c15_i32 : i32 to vector<1x256xi32>
    %25 = arith.cmpi slt, %17, %24 : vector<1x256xi32>
    %c16_i32_6 = arith.constant 16 : i32
    %26 = tpu.dynamic_rotate %0 by %c16_i32_6 dim 1 : vector<8x256xf32>, i32 -> vector<8x256xf32>
    %cst = arith.constant 0.000000e+00 : f32
    %27 = vector.shape_cast %19 : vector<1x256xi1> to vector<1x256xi1>
    %28 = vector.broadcast %27 : vector<1x256xi1> to vector<8x256xi1>
    %29 = vector.broadcast %cst : f32 to vector<8x256xf32>
    %30 = arith.select %28, %26, %29 : vector<8x256xi1>, vector<8x256xf32>
    %c240_i32_7 = arith.constant 240 : i32
    %31 = tpu.dynamic_rotate %0 by %c240_i32_7 dim 1 : vector<8x256xf32>, i32 -> vector<8x256xf32>
    %cst_8 = arith.constant 0.000000e+00 : f32
    %32 = vector.shape_cast %21 : vector<1x256xi1> to vector<1x256xi1>
    %33 = vector.broadcast %32 : vector<1x256xi1> to vector<8x256xi1>
    %34 = vector.broadcast %cst_8 : f32 to vector<8x256xf32>
    %35 = arith.select %33, %31, %34 : vector<8x256xi1>, vector<8x256xf32>
    %cst_9 = arith.constant 2.000000e+00 : f32
    %36 = vector.broadcast %cst_9 : f32 to vector<8x256xf32>
    %37 = arith.mulf %36, %0 : vector<8x256xf32>
    %38 = arith.addf %30, %37 : vector<8x256xf32>
    %39 = arith.addf %38, %35 : vector<8x256xf32>
    %40 = arith.subf %30, %35 : vector<8x256xf32>
    %c1_i32_10 = arith.constant 1 : i32
    %41 = tpu.dynamic_rotate %39 by %c1_i32_10 dim 1 : vector<8x256xf32>, i32 -> vector<8x256xf32>
    %cst_11 = arith.constant 0.000000e+00 : f32
    %42 = vector.shape_cast %23 : vector<1x256xi1> to vector<1x256xi1>
    %43 = vector.broadcast %42 : vector<1x256xi1> to vector<8x256xi1>
    %44 = vector.broadcast %cst_11 : f32 to vector<8x256xf32>
    %45 = arith.select %43, %41, %44 : vector<8x256xi1>, vector<8x256xf32>
    %c255_i32 = arith.constant 255 : i32
    %46 = tpu.dynamic_rotate %39 by %c255_i32 dim 1 : vector<8x256xf32>, i32 -> vector<8x256xf32>
    %cst_12 = arith.constant 0.000000e+00 : f32
    %47 = vector.shape_cast %25 : vector<1x256xi1> to vector<1x256xi1>
    %48 = vector.broadcast %47 : vector<1x256xi1> to vector<8x256xi1>
    %49 = vector.broadcast %cst_12 : f32 to vector<8x256xf32>
    %50 = arith.select %48, %46, %49 : vector<8x256xi1>, vector<8x256xf32>
    %c1_i32_13 = arith.constant 1 : i32
    %51 = tpu.dynamic_rotate %40 by %c1_i32_13 dim 1 : vector<8x256xf32>, i32 -> vector<8x256xf32>
    %cst_14 = arith.constant 0.000000e+00 : f32
    %52 = vector.shape_cast %23 : vector<1x256xi1> to vector<1x256xi1>
    %53 = vector.broadcast %52 : vector<1x256xi1> to vector<8x256xi1>
    %54 = vector.broadcast %cst_14 : f32 to vector<8x256xf32>
    %55 = arith.select %53, %51, %54 : vector<8x256xi1>, vector<8x256xf32>
    %c255_i32_15 = arith.constant 255 : i32
    %56 = tpu.dynamic_rotate %40 by %c255_i32_15 dim 1 : vector<8x256xf32>, i32 -> vector<8x256xf32>
    %cst_16 = arith.constant 0.000000e+00 : f32
    %57 = vector.shape_cast %25 : vector<1x256xi1> to vector<1x256xi1>
    %58 = vector.broadcast %57 : vector<1x256xi1> to vector<8x256xi1>
    %59 = vector.broadcast %cst_16 : f32 to vector<8x256xf32>
    %60 = arith.select %58, %56, %59 : vector<8x256xi1>, vector<8x256xf32>
    %61 = arith.subf %45, %50 : vector<8x256xf32>
    %cst_17 = arith.constant 2.000000e+00 : f32
    %62 = vector.broadcast %cst_17 : f32 to vector<8x256xf32>
    %63 = arith.mulf %62, %40 : vector<8x256xf32>
    %64 = arith.addf %55, %63 : vector<8x256xf32>
    %65 = arith.addf %64, %60 : vector<8x256xf32>
    %66 = arith.mulf %61, %61 : vector<8x256xf32>
    %67 = arith.mulf %65, %65 : vector<8x256xf32>
    %68 = arith.addf %66, %67 : vector<8x256xf32>
    %cst_18 = arith.constant 9.99999974E-6 : f32
    %69 = vector.broadcast %cst_18 : f32 to vector<8x256xf32>
    %70 = arith.addf %68, %69 : vector<8x256xf32>
    %71 = math.sqrt %70 : vector<8x256xf32>
    %c0_19 = arith.constant 0 : index
    %c0_20 = arith.constant 0 : index
    %72 = vector.load %arg2[%c0_19, %c0_20] : memref<8x256xf32, #tpu.memory_space<vmem>>, vector<8x256xf32>
    tpu.vector_store %arg2[%c0_19, %c0_20], %71 {strides = array<i32>} : memref<8x256xf32, #tpu.memory_space<vmem>>, vector<8x256xf32>,
    return
  }
  func.func @transform_0(%arg0: i32) -> (i32, i32) {
    %c0_i32 = arith.constant 0 : i32
    %c0_i32_0 = arith.constant 0 : i32
    return %arg0, %c0_i32 : i32, i32
  }
  func.func @transform_1(%arg0: i32) -> (i32, i32) {
    %c0_i32 = arith.constant 0 : i32
    %c0_i32_0 = arith.constant 0 : i32
    return %arg0, %c0_i32 : i32, i32
  }
}

</mosaic_0001>

<bundles_post_ra>
// kernel: sobel_magnitude.1
= control target key start
LH: loop header
LB: loop body
LE: loop exit
PB: predicated region body
PF: predicated region fallthrough
CT: control target
= control target key end

     0   :  { %s165_s8 = smov 112   ;;  %s166_s9 = smov 16   ;;  %v10_v2 = vlaneseq  ;;  %s240_s0 = inlined_call_operand.vmem [shape: f32[8,256], index: 0, kind: input, shape index: {}]   ;;  %s241_s1 = inlined_call_operand.vmem [shape: f32[8,256], index: 1, kind: output, shape index: {}]  }
   0x1   :  { %v8_v0 = vld [vmem:[%s240_s0] sm:$0xff]  ;;  %v9_v1 = vld [vmem:[%s240_s0 + $0x8] sm:$0xff]  ;;  %s167_s0 = smov 1   ;;  %s168_s12 = smov 127  }
   0x2   :  { %58 = vrot.lane.b32.xlu1 %v8_v0, %s165_s8  ;;  %45 = vrot.lane.b32.xlu0 %v8_v0, %s166_s9  ;;  %v185_v3 = vand.u32 127, %v10_v2  ;;  %v71_v7 = vmul.f32 2.0, %v8_v0  ;;  %v72_v8 = vmul.f32 2.0, %v9_v1 }
   0x4   :  { %v12_v4 = vadd.s32 128, %v185_v3  ;;  %vm62_vm0 = vcmp.lt.s32.totalorder %v185_v3, 112  ;;  %vm49_vm1 = vcmp.lt.s32.totalorder %v185_v3, 16  ;;  %vm37_vm3 = vcmp.ge.s32.totalorder %v185_v3, 16 }
   0x5   :  { %v17_v25 = vand.u32 15, %v185_v3  ;;  %vm83_vm4 = vcmp.lt.s32.totalorder %v185_v3, 1  ;;  %vm96_vm7 = vcmp.lt.s32.totalorder %v185_v3, 127 }
   0x6   :  { %60 = vrot.lane.b32.xlu1 %v9_v1, %s165_s8  ;;  %47 = vrot.lane.b32.xlu0 %v9_v1, %s166_s9  ;;  %vm40_vm2 = vcmp.lt.s32.totalorder %v12_v4, 240  ;;  %v24_v26 = vand.u32 15, %v12_v4 }
   0x7   :  { %vm193_vm5 = vcmp.gt.s32.totalorder %v17_v25, 0  ;;  %vm202_vm8 = vcmp.lt.s32.totalorder %v17_v25, 15 }
   0x8   :  { %vm197_vm6 = vcmp.gt.s32.totalorder %v24_v26, 0  ;;  %vm206_vm9 = vcmp.lt.s32.totalorder %v24_v26, 15 }
  0x74   :  { %v59_v5 = vpop.permute.xlu1 %58  ;;  %v46_v6 = vpop.permute.xlu0 %45 }
  0x78   :  { %v61_v9 = vpop.permute.xlu1 %60  ;;  %v48_v10 = vpop.permute.xlu0 %47 }
  0x79   :  { %v63_v11 = vsel %vm62_vm0, %v59_v5, %v61_v9  ;;  %v64_v12 = vsel %vm62_vm0, %v61_v9, %v59_v5  ;;  %v50_v13 = vsel %vm49_vm1, %v46_v6, %v48_v10  ;;  %v51_v14 = vsel %vm49_vm1, %v48_v10, %v46_v6 }
  0x7a   :  { %v70_v15 = vsel %vm40_vm2, %v64_v12, 0.0  ;;  %v56_v16 = vsel %vm37_vm3, %v51_v14, 0.0  ;;  %v74_v18 = vadd.f32 %v72_v8, %v50_v13 }
  0x7b   :  { %v73_v17 = vadd.f32 %v71_v7, %v56_v16  ;;  %v77_v19 = vsub.f32 %v56_v16, %v63_v11  ;;  %v78_v20 = vsub.f32 %v50_v13, %v70_v15 }
  0x7c   :  { %v76_v21 = vadd.f32 %v74_v18, %v70_v15 }
  0x7d   :  { %105 = vrot.lane.b32.xlu0 %v77_v19, %s167_s0  ;;  %107 = vrot.lane.b32.xlu1 %v78_v20, %s167_s0  ;;  %v75_v22 = vadd.f32 %v73_v17, %v63_v11  ;;  %v123_v43 = vmul.f32 2.0, %v77_v19  ;;  %v124_v44 = vmul.f32 2.0, %v78_v20 }
  0x81   :  { %81 = vrot.lane.b32.xlu1 %v76_v21, %s167_s0  ;;  %79 = vrot.lane.b32.xlu0 %v75_v22, %s167_s0 }
  0x85   :  { %94 = vrot.lane.b32.xlu1 %v76_v21, %s168_s12  ;;  %92 = vrot.lane.b32.xlu0 %v75_v22, %s168_s12 }
  0x89   :  { %115 = vrot.lane.b32.xlu1 %v78_v20, %s168_s12  ;;  %113 = vrot.lane.b32.xlu0 %v77_v19, %s168_s12 }
  0xef   :  { %v106_v23 = vpop.permute.xlu0 %105  ;;  %v108_v24 = vpop.permute.xlu1 %107 }
  0xf0   :  { %v109_v31 = vsel %vm83_vm4, %v106_v23, %v108_v24  ;;  %v110_v32 = vsel %vm83_vm4, %v108_v24, %v106_v23 }
  0xf1   :  { %v111_v35 = vsel %vm193_vm5, %v110_v32, 0.0  ;;  %v112_v36 = vsel %vm197_vm6, %v109_v31, 0.0 }
  0xf2   :  { %v125_v47 = vadd.f32 %v123_v43, %v111_v35  ;;  %v126_v48 = vadd.f32 %v124_v44, %v112_v36 }
  0xf3   :  { %v82_v27 = vpop.permute.xlu1 %81  ;;  %v80_v28 = vpop.permute.xlu0 %79 }
  0xf4   :  { %v84_v39 = vsel %vm83_vm4, %v80_v28, %v82_v27  ;;  %v85_v40 = vsel %vm83_vm4, %v82_v27, %v80_v28 }
  0xf5   :  { %v90_v49 = vsel %vm193_vm5, %v85_v40, 0.0  ;;  %v91_v50 = vsel %vm197_vm6, %v84_v39, 0.0 }
  0xf7   :  { %v95_v37 = vpop.permute.xlu1 %94  ;;  %v93_v38 = vpop.permute.xlu0 %92 }
  0xf8   :  { %v97_v41 = vsel %vm96_vm7, %v93_v38, %v95_v37  ;;  %v98_v42 = vsel %vm96_vm7, %v95_v37, %v93_v38 }
  0xf9   :  { %v103_v45 = vsel %vm202_vm8, %v97_v41, 0.0  ;;  %v104_v46 = vsel %vm206_vm9, %v98_v42, 0.0 }
  0xfa   :  { %v121_v53 = vsub.f32 %v90_v49, %v103_v45  ;;  %v122_v54 = vsub.f32 %v91_v50, %v104_v46 }
  0xfb   :  { %v116_v51 = vpop.permute.xlu1 %115  ;;  %v114_v52 = vpop.permute.xlu0 %113 }
  0xfc   :  { %v117_v55 = vsel %vm96_vm7, %v114_v52, %v116_v51  ;;  %v118_v56 = vsel %vm96_vm7, %v116_v51, %v114_v52  ;;  %v129_v61 = vmul.f32 %v121_v53, %v121_v53  ;;  %v130_v62 = vmul.f32 %v122_v54, %v122_v54 }
  0xfd   :  { %v119_v57 = vsel %vm202_vm8, %v117_v55, 0.0  ;;  %v120_v58 = vsel %vm206_vm9, %v118_v56, 0.0 }
  0xfe   :  { %v127_v59 = vadd.f32 %v125_v47, %v119_v57  ;;  %v128_v60 = vadd.f32 %v126_v48, %v120_v58 }
 0x100   :  { %v131_v63 = vmul.f32 %v127_v59, %v127_v59  ;;  %v132_v0 = vmul.f32 %v128_v60, %v128_v60 }
 0x102   :  { %v133_v1 = vadd.f32 %v131_v63, %v129_v61  ;;  %v134_v2 = vadd.f32 %v132_v0, %v130_v62 }
 0x104   :  { %v135_v4 = vadd.f32 1e-05, %v133_v1  ;;  %v136_v5 = vadd.f32 1e-05, %v134_v2 }
 0x106   :  { %161 = vrsqrt.f32 %v135_v4  ;;  %vm139_vm10 = vcmp.eq.f32.partialorder %v135_v4, inf  ;;  %v142_v8 = vand.u32 2147483648, %v135_v4  ;;  %vm141_vm11 = vcmp.eq.f32.partialorder %v135_v4, 0.0 }
 0x107   :  { %163 = vrsqrt.f32 %v136_v5  ;;  %vm146_vm12 = vcmp.eq.f32.partialorder %v136_v5, inf  ;;  %v149_v11 = vand.u32 2147483648, %v136_v5  ;;  %vm148_vm13 = vcmp.eq.f32.partialorder %v136_v5, 0.0 }
 0x110   :  { %v162_v3 = vpop.eup %161 }
 0x111   :  { %v164_v6 = vpop.eup %163  ;;  %v138_v7 = vmul.f32 %v162_v3, %v135_v4 }
 0x112   :  { %v145_v9 = vmul.f32 %v164_v6, %v136_v5 }
 0x113   :  { %v140_v10 = vsel %vm139_vm10, %v135_v4, %v138_v7 }
 0x114   :  { %v143_v12 = vsel %vm141_vm11, %v142_v8, %v140_v10  ;;  %v147_v13 = vsel %vm146_vm12, %v136_v5, %v145_v9 }
 0x115   :  { %v150_v14 = vsel %vm148_vm13, %v149_v11, %v147_v13  ;;  %151 = vst [vmem:[%s241_s1] sm:$0xff] %v143_v12 }
 0x116   :  { %152 = vst [vmem:[%s241_s1 + $0x8] sm:$0xff] %v150_v14 }

</bundles_post_ra>
